<compile_context>
chip_gen: v6e
topology: v6e:2x2x1
jax: 0.10.0
libtpu: 0.0.40
codegen_flags: <defaults>
</compile_context>

<pallas_src>
import jax
import jax.numpy as jnp
from jax.experimental import pallas as pl
from jax.experimental.pallas import tpu as pltpu


def _norm_kernel(x_ref, o_ref):
    # x_ref / o_ref: (row_tile, D) VMEM tiles.
    x = x_ref[...].astype(jnp.float32)
    mn = jnp.min(x, axis=-1, keepdims=True)          # per-row min  (XLU)
    mx = jnp.max(x, axis=-1, keepdims=True)          # per-row max  (XLU)
    inv = pl.reciprocal(mx - mn, approx=False)       # one EUP recip per row
    o_ref[...] = ((x - mn) * inv).astype(o_ref.dtype)


def _round_up(a, b):
    return ((a + b - 1) // b) * b


def norm_layer(x,
               target_block_bytes=2 * 1024 * 1024,
               vmem_limit_bytes=32 * 1024 * 1024):
    """Per-row min-max normalization: (x - min_row) / (max_row - min_row)."""
    N, D = x.shape
    dtype_bytes = jnp.dtype(x.dtype).itemsize
    # Minimum sublane multiple for this dtype's packing.
    sublane = {4: 8, 2: 16, 1: 32}.get(dtype_bytes, 8)

    # Pick row_tile so one block is ~target_block_bytes (mem-bound kernel:
    # big blocks -> near HBM roofline), rounded to the sublane multiple and
    # capped at the (sublane-rounded) number of rows.
    row_tile = max(1, target_block_bytes // (D * dtype_bytes))
    row_tile = max(sublane, (row_tile // sublane) * sublane)
    row_tile = min(row_tile, _round_up(N, sublane))

    padded_n = _round_up(N, row_tile)
    x_in = x if padded_n == N else jnp.pad(x, ((0, padded_n - N), (0, 0)))

    grid = (padded_n // row_tile,)

    out = pl.pallas_call(
        _norm_kernel,
        out_shape=jax.ShapeDtypeStruct((padded_n, D), x.dtype),
        grid_spec=pltpu.PrefetchScalarGridSpec(
            num_scalar_prefetch=0,
            grid=grid,
            in_specs=[pl.BlockSpec((row_tile, D), lambda i: (i, 0))],
            out_specs=pl.BlockSpec((row_tile, D), lambda i: (i, 0)),
        ),
        compiler_params=pltpu.CompilerParams(
            dimension_semantics=("parallel",),   # rows are independent -> megacore shardable
            vmem_limit_bytes=vmem_limit_bytes,
        ),
    )(x_in)

    return out if padded_n == N else out[:N]


def _reference(x):
    mn = jnp.min(x, axis=1, keepdims=True)
    mx = jnp.max(x, axis=1, keepdims=True)
    return (x - mn) / (mx - mn)


if __name__ == "__main__":
    key = jax.random.PRNGKey(0)

    # Small shape consistent with the forward: 2-D [N, D], reduce over D.
    N, D = 16, 128
    x = jax.random.normal(key, (N, D), dtype=jnp.float32)

    out = jax.block_until_ready(norm_layer(x))
    ref = _reference(x)
    assert out.shape == ref.shape
    assert jnp.allclose(out, ref, atol=1e-6, rtol=1e-5), "mismatch vs reference (f32)"

    # Ragged-N path (exercises padding + slice); still small.
    key2 = jax.random.PRNGKey(1)
    x2 = jax.random.normal(key2, (20, 128), dtype=jnp.float32)
    out2 = jax.block_until_ready(norm_layer(x2))
    ref2 = _reference(x2)
    assert out2.shape == ref2.shape
    assert jnp.allclose(out2, ref2, atol=1e-6, rtol=1e-5), "mismatch vs reference (ragged N)"

    print("KERNEL_OK")
</pallas_src>

<mosaic_0001>
module attributes {stable_mosaic.version = 11 : i64} {
  func.func @_norm_kernel(%arg0: i32, %arg1: memref<16x128xf32, #tpu.memory_space<vmem>>, %arg2: memref<16x128xf32, #tpu.memory_space<vmem>>) attributes {dimension_semantics = [#tpu.dimension_semantics<parallel>], iteration_bounds = array<i64: 1>, scalar_prefetch = 0 : i64, scratch_operands = 0 : i64, tpu.core_type = #tpu.core_type<tc>, window_params = [{transform_indices = @transform_0, window_bounds = array<i64: 16, 128>}, {transform_indices = @transform_1, window_bounds = array<i64: 16, 128>}]} {
    %c0 = arith.constant 0 : index
    %c0_0 = arith.constant 0 : index
    %0 = vector.load %arg1[%c0, %c0_0] : memref<16x128xf32, #tpu.memory_space<vmem>>, vector<16x128xf32>
    %cst = arith.constant dense<0x7F800000> : vector<16xf32>
    %1 = vector.multi_reduction <minimumf>, %0, %cst [1] : vector<16x128xf32> to vector<16xf32>
    %2 = vector.shape_cast %1 : vector<16xf32> to vector<16x1xf32>
    %cst_1 = arith.constant dense<0xFF800000> : vector<16xf32>
    %3 = vector.multi_reduction <maximumf>, %0, %cst_1 [1] : vector<16x128xf32> to vector<16xf32>
    %4 = vector.shape_cast %3 : vector<16xf32> to vector<16x1xf32>
    %5 = arith.subf %4, %2 : vector<16x1xf32>
    %6 = tpu.reciprocal %5 : vector<16x1xf32> -> vector<16x1xf32>
    %7 = vector.broadcast %2 : vector<16x1xf32> to vector<16x128xf32>
    %8 = arith.subf %0, %7 : vector<16x128xf32>
    %9 = vector.broadcast %6 : vector<16x1xf32> to vector<16x128xf32>
    %10 = arith.mulf %8, %9 : vector<16x128xf32>
    %c0_2 = arith.constant 0 : index
    %c0_3 = arith.constant 0 : index
    %11 = vector.load %arg2[%c0_2, %c0_3] : memref<16x128xf32, #tpu.memory_space<vmem>>, vector<16x128xf32>
    tpu.vector_store %arg2[%c0_2, %c0_3], %10 {strides = array<i32>} : memref<16x128xf32, #tpu.memory_space<vmem>>, vector<16x128xf32>,
    return
  }
  func.func @transform_0(%arg0: i32) -> (i32, i32) {
    %c0_i32 = arith.constant 0 : i32
    %c0_i32_0 = arith.constant 0 : i32
    return %arg0, %c0_i32 : i32, i32
  }
  func.func @transform_1(%arg0: i32) -> (i32, i32) {
    %c0_i32 = arith.constant 0 : i32
    %c0_i32_0 = arith.constant 0 : i32
    return %arg0, %c0_i32 : i32, i32
  }
}

</mosaic_0001>

<bundles_post_ra>
// kernel: tpu_custom_call.1
= control target key start
LH: loop header
LB: loop body
LE: loop exit
PB: predicated region body
PF: predicated region fallthrough
CT: control target
= control target key end

     0   :  { %6 = vsyncpa [#allocation3], 0  ;;  %s138_s0 = inlined_call_operand.hbm [shape: f32[16,128], index: 0, kind: input, shape index: {}]   ;;  %s139_s1 = inlined_call_operand.hbm [shape: f32[16,128], index: 1, kind: output, shape index: {}]  }
   0x1   :  { %7 = vsyncpa [#allocation4], 0  ;;  %s112_s6 = smov [#allocation2]  }
   0x2   :  { %s13_s7 = sshll.u32 %s112_s6, 4  ;;  %s14_s7 = int_to_ptr.vmem [resolvable:$true] %s13_s7 }
   0x3   :  { %s76_s8 = scalar_lea.vmem %s14_s7, 256  ;;  %p81_p1 = scmp.lt.s32.totalorder %s14_s7, %s14_s7 }
   0x4   :  { %p77_p0 = scmp.ne.s32.totalorder %s14_s7, %s76_s8  ;;  %p82_p2 = scmp.lt.s32.totalorder %s76_s8, %s76_s8 }
   0x6   :  { %p83_p3 = por %p82_p2, %p81_p1 }
   0x8   :  { %p84_p4 = pnand %p83_p3, %p77_p0 }
   0xa   :  { %87 = shalt.err (!%p84_p4)
}
   0xb   :  { %s113_s9 = smov 128   ;;  %s114_s10 = smov 8  }
   0xc   :  { %19 = dma.hbm_to_vmem [thread:$0]  %s138_s0, 256, %s14_s7, [#allocation3], %s113_s9, %s113_s9, %s114_s10  }
   0xd   :  { %108 = dma.done.wait [#allocation3], 256  }
   0xe   :  { %109 = vsyncadd [#allocation3], 4294967040  ;;  %v23_v0 = vld [vmem:[#allocation2] sm:$0xff]  ;;  %v24_v1 = vld [vmem:[#allocation2 + $0x8] sm:$0xff]  ;;  %s115_s0 = smov [#allocation5]  }
   0xf   :  { %29 = vmax.xlane.f32.xlu1 %v23_v0  ;;  %25 = vmin.xlane.f32.xlu0 %v23_v0  ;;  %s48_s13 = sshll.u32 %s115_s0, 4  ;;  %s49_s13 = int_to_ptr.vmem [resolvable:$true] %s48_s13 }
  0x10   :  { %s88_s14 = scalar_lea.vmem %s49_s13, 256  ;;  %p93_p6 = scmp.lt.s32.totalorder %s49_s13, %s49_s13 }
  0x11   :  { %p89_p5 = scmp.ne.s32.totalorder %s49_s13, %s88_s14  ;;  %p94_p7 = scmp.lt.s32.totalorder %s88_s14, %s88_s14 }
  0x13   :  { %31 = vmax.xlane.f32.xlu1 %v24_v1  ;;  %27 = vmin.xlane.f32.xlu0 %v24_v1  ;;  %p95_p8 = por %p94_p7, %p93_p6 }
  0x15   :  { %p96_p9 = pnand %p95_p8, %p89_p5 }
  0x98   :  { %v30_v2 = vpop.xlane.xlu1 %29  ;;  %v26_v3 = vpop.xlane.xlu0 %25 }
  0x99   :  { %v33_v4 = vsub.f32 %v30_v2, %v26_v3  ;;  %v37_v8 = vsub.f32 %v23_v0, %v26_v3 }
  0x9b   :  { %64 = vrcp.f32 %v33_v4 }
  0x9c   :  { %v32_v5 = vpop.xlane.xlu1 %31  ;;  %v28_v6 = vpop.xlane.xlu0 %27 }
  0x9d   :  { %v34_v7 = vsub.f32 %v32_v5, %v28_v6  ;;  %v38_v11 = vsub.f32 %v24_v1, %v28_v6 }
  0x9f   :  { %66 = vrcp.f32 %v34_v7 }
  0xa8   :  { %v65_v9 = vpop.eup %64 }
  0xa9   :  { %v39_v10 = vmul.f32 %v65_v9, %v37_v8 }
  0xab   :  { %41 = vst [vmem:[#allocation5] sm:$0xff] %v39_v10 }
  0xac   :  { %v67_v12 = vpop.eup %66 }
  0xad   :  { %v40_v13 = vmul.f32 %v67_v12, %v38_v11 }
  0xaf   :  { %42 = vst [vmem:[#allocation5 + $0x8] sm:$0xff] %v40_v13 }
  0xb0   :  { %99 = shalt.err (!%p96_p9)
}
  0xb1   :  { %54 = dma.vmem_to_hbm [thread:$0]  %s49_s13, 256, %s139_s1, [#allocation4], %s113_s9, %s113_s9, %s114_s10  }
  0xb2   :  { %110 = dma.done.wait [#allocation4], 256  }
  0xb3   :  { %111 = vsyncadd [#allocation4], 4294967040 }
  0xb4   :  { %58 = vsyncpa [#allocation3], 1 }
  0xb5   :  { %59 = vsyncpa [#allocation4], 1 }

</bundles_post_ra>
